<compile_context>
chip_gen: v5e
topology: v5e:2x2
jax: 0.10.0
libtpu: 0.0.40
codegen_flags: <defaults>
</compile_context>

<pallas_src>
import jax
import jax.numpy as jnp
from jax.experimental import pallas as pl
from jax.experimental.pallas import tpu as pltpu

_LANE = 128


def _tpu_generation():
    """Best-effort TPU generation tag ('v5', 'v6', 'v7') or None."""
    try:
        kind = jax.devices()[0].device_kind.lower()
    except Exception:
        return None
    for tag in ("v7", "v6", "v5"):
        if tag in kind:
            return tag
    return None


def _copy_plan(dtype):
    """(target_block_bytes, vmem_limit_bytes_or_None, min_grid_steps, sublane_mult)."""
    gen = _tpu_generation()
    if gen == "v7":
        # 4 double-buffered 8 MiB buffers = 32 MiB; raise the scoped limit to
        # 48 MiB (physical VMEM is 64 MiB per TensorCore on v7x).
        target_bytes = 8 * 1024 * 1024
        vmem_limit = 48 * 1024 * 1024
        min_steps = 4          # 2 TensorCores -> want >=2 steps per core
    elif gen == "v6":
        # 4 x 4 MiB = 16 MiB, under the 32 MiB scoped default — no limit bump.
        target_bytes = 4 * 1024 * 1024
        vmem_limit = None
        min_steps = 2
    else:
        # v5e (or unknown): 4 x 2 MiB = 8 MiB fits the 16 MiB scoped default.
        target_bytes = 2 * 1024 * 1024
        vmem_limit = None
        min_steps = 2
    itemsize = jnp.dtype(dtype).itemsize
    # Sub-32-bit dtypes pack along sublanes: one bf16 vreg is [16,128], one
    # int8/fp8 vreg is [32,128].  Round row tiles accordingly.
    sublane_mult = max(8, 32 // max(1, itemsize))
    return target_bytes, vmem_limit, min_steps, sublane_mult


def _copy_kernel(x_ref, o_ref):
    # Straight pass-through of the current (block_rows, 128) tile.
    o_ref[...] = x_ref[...]


def _pallas_copy_lanes(x2d: jax.Array) -> jax.Array:
    """Streaming HBM->HBM copy of a lane-dense (rows, 128) array."""
    rows, cols = x2d.shape
    itemsize = jnp.dtype(x2d.dtype).itemsize
    target_bytes, vmem_limit, min_steps, sub_mult = _copy_plan(x2d.dtype)

    # Largest row-tile that keeps one buffer <= target_bytes.
    max_rows = max(sub_mult, target_bytes // (cols * itemsize))
    block_rows = min(rows, max_rows)

    if block_rows < rows:
        # Not a single full-extent tile: keep the sublane (second-minor) dim
        # aligned to the packed-vreg height for this dtype.
        block_rows = max(sub_mult, (block_rows // sub_mult) * sub_mult)
        # Megacore hygiene: if we need more than one tile anyway, make sure
        # there are enough grid steps for dimension_semantics=("parallel",)
        # to shard across TensorCores (v7x has 2 TCs per chip).
        if pl.cdiv(rows, block_rows) < min_steps:
            capped = pl.cdiv(rows, min_steps)
            capped = max(sub_mult, (capped // sub_mult) * sub_mult)
            block_rows = min(block_rows, capped)

    grid = (pl.cdiv(rows, block_rows),)
    nbytes = rows * cols * itemsize

    compiler_kwargs = dict(dimension_semantics=("parallel",))
    if vmem_limit is not None:
        compiler_kwargs["vmem_limit_bytes"] = vmem_limit

    return pl.pallas_call(
        _copy_kernel,
        out_shape=jax.ShapeDtypeStruct((rows, cols), x2d.dtype),
        grid_spec=pltpu.PrefetchScalarGridSpec(
            num_scalar_prefetch=0,
            grid=grid,
            # Default double-buffering (Buffered(2)) — a pure HBM stream is
            # bandwidth-bound; spare VMEM goes to bigger tiles, not depth.
            in_specs=[pl.BlockSpec((block_rows, cols), lambda i: (i, 0))],
            out_specs=pl.BlockSpec((block_rows, cols), lambda i: (i, 0)),
        ),
        compiler_params=pltpu.CompilerParams(**compiler_kwargs),
        # Pure memory op: 1x read + 1x write, zero flops — lets the XLA
        # scheduler overlap it with neighboring compute.
        cost_estimate=pl.CostEstimate(
            flops=0, transcendentals=0, bytes_accessed=2 * nbytes
        ),
    )(x2d)


def identity_vit_layer(hidden_states: jax.Array, *args,
                       use_pallas_copy: bool = False, **kwargs):
    """Pallas equivalent of IdentityViTLayer.forward.

    Args:
      hidden_states: (batch, seq, hidden) array (any shape/dtype works).
      use_pallas_copy: if False (default, production path), return the input
        unchanged — the identity needs no HBM traffic.  If True, route the
        tensor through the tiled lane-dense Pallas copy kernel (materializes a
        fresh buffer).  If a copy with buffer reuse is wanted instead, prefer
        donating the input under jit / input_output_aliases rather than this
        kernel.

    Returns:
      A 1-tuple (hidden_states,) matching the PyTorch output convention.
    """
    if not use_pallas_copy:
        # Highest-value path: skip the kernel entirely.
        return (hidden_states,)

    orig_shape = hidden_states.shape
    total = int(hidden_states.size)
    if total == 0:
        return (hidden_states,)

    # Always present a lane-dense (N, 128) view so stores lower to unmasked
    # vst.  If the element count is ragged, pad the flat view to the next
    # multiple of 128 and slice afterwards (bit-exact identity either way).
    flat = hidden_states.reshape(-1)
    padded_total = pl.cdiv(total, _LANE) * _LANE
    if padded_total != total:
        flat = jnp.pad(flat, (0, padded_total - total))
    x2d = flat.reshape(padded_total // _LANE, _LANE)

    out2d = _pallas_copy_lanes(x2d)
    out = out2d.reshape(-1)
    if padded_total != total:
        out = out[:total]
    return (out.reshape(orig_shape),)


if __name__ == "__main__":
    key = jax.random.PRNGKey(0)
    batch, seq, hidden = 2, 8, 32
    hidden_states = jax.random.normal(key, (batch, seq, hidden),
                                      dtype=jnp.float32)

    # 1) Production path: zero-cost identity (no kernel launch).
    (y_fast,) = identity_vit_layer(hidden_states)
    jax.block_until_ready(y_fast)
    assert y_fast.shape == hidden_states.shape
    assert y_fast.dtype == hidden_states.dtype
    assert bool(jnp.all(y_fast == hidden_states))

    # 2) Pallas copy path: lane-dense tiled copy kernel (f32).
    (y_copy,) = identity_vit_layer(hidden_states, use_pallas_copy=True)
    jax.block_until_ready(y_copy)
    assert y_copy.shape == hidden_states.shape
    assert y_copy.dtype == hidden_states.dtype
    assert bool(jnp.all(y_copy == hidden_states))

    # 3) Pallas copy path with a packed dtype (exercises dtype-aware sublane
    #    rounding) — bf16 is the common ViT activation dtype.
    hs_bf16 = hidden_states.astype(jnp.bfloat16)
    (y_bf16,) = identity_vit_layer(hs_bf16, use_pallas_copy=True)
    jax.block_until_ready(y_bf16)
    assert y_bf16.shape == hs_bf16.shape
    assert y_bf16.dtype == hs_bf16.dtype
    assert bool(jnp.all(y_bf16 == hs_bf16))

    # 4) Ragged element count (exercises the pad-to-128 fallback).
    hs_odd = jax.random.normal(jax.random.PRNGKey(1), (2, 7, 30),
                               dtype=jnp.float32)
    (y_odd,) = identity_vit_layer(hs_odd, use_pallas_copy=True)
    jax.block_until_ready(y_odd)
    assert y_odd.shape == hs_odd.shape
    assert y_odd.dtype == hs_odd.dtype
    assert bool(jnp.all(y_odd == hs_odd))

    print("KERNEL_OK")
</pallas_src>

<mosaic_0001>
module attributes {stable_mosaic.version = 11 : i64} {
  func.func @_copy_kernel(%arg0: i32, %arg1: memref<4x128xf32, #tpu.memory_space<vmem>>, %arg2: memref<4x128xf32, #tpu.memory_space<vmem>>) attributes {dimension_semantics = [#tpu.dimension_semantics<parallel>], iteration_bounds = array<i64: 1>, scalar_prefetch = 0 : i64, scratch_operands = 0 : i64, tpu.core_type = #tpu.core_type<tc>, window_params = [{transform_indices = @transform_0, window_bounds = array<i64: 4, 128>}, {transform_indices = @transform_1, window_bounds = array<i64: 4, 128>}]} {
    %c0 = arith.constant 0 : index
    %c0_0 = arith.constant 0 : index
    %0 = vector.load %arg1[%c0, %c0_0] : memref<4x128xf32, #tpu.memory_space<vmem>>, vector<4x128xf32>
    %c0_1 = arith.constant 0 : index
    %c0_2 = arith.constant 0 : index
    %1 = vector.load %arg2[%c0_1, %c0_2] : memref<4x128xf32, #tpu.memory_space<vmem>>, vector<4x128xf32>
    tpu.vector_store %arg2[%c0_1, %c0_2], %0 {strides = array<i32>} : memref<4x128xf32, #tpu.memory_space<vmem>>, vector<4x128xf32>,
    return
  }
  func.func @transform_0(%arg0: i32) -> (i32, i32) {
    %c0_i32 = arith.constant 0 : i32
    %c0_i32_0 = arith.constant 0 : i32
    return %arg0, %c0_i32 : i32, i32
  }
  func.func @transform_1(%arg0: i32) -> (i32, i32) {
    %c0_i32 = arith.constant 0 : i32
    %c0_i32_0 = arith.constant 0 : i32
    return %arg0, %c0_i32 : i32, i32
  }
}

</mosaic_0001>

<bundles_post_ra>
// kernel: tpu_custom_call.1
= control target key start
LH: loop header
LB: loop body
LE: loop exit
PB: predicated region body
PF: predicated region fallthrough
CT: control target
= control target key end

     0   :  { %6 = vsyncpa [#allocation3], 0  ;;  %s114_s0 = inlined_call_operand.hbm [shape: f32[4,128], index: 0, kind: input, shape index: {}]   ;;  %s115_s1 = inlined_call_operand.hbm [shape: f32[4,128], index: 1, kind: output, shape index: {}]  }
   0x1   :  { %7 = vsyncpa [#allocation4], 0  ;;  %s13_s8 = sshll.u32 %s114_s0, 4  ;;  %s96_s9 = smov [#allocation2]   ;;  %s14_s8 = int_to_ptr.hbm [resolvable:$true] %s13_s8 }
   0x2   :  { %s15_s10 = sshll.u32 %s96_s9, 4  ;;  %s16_s10 = int_to_ptr.vmem [resolvable:$true] %s15_s10 }
   0x3   :  { %18 = dma.hbm_to_vmem [thread:$0]  %s14_s8, 64, %s16_s10, [#allocation3]  }
   0x4   :  { %92 = dma.done.wait [#allocation3], 64  }
   0x5   :  { %93 = vsyncadd [#allocation3], 4294967232  ;;  %s97_s11 = smov [#allocation5]   ;;  %s32_s15 = sshll.u32 %s115_s1, 4  ;;  %v23_v0 = vld [vmem:[#allocation2] sm:$0xf]  ;;  %s33_s15 = int_to_ptr.hbm [resolvable:$true] %s32_s15 }
   0x6   :  { %s30_s12 = sshll.u32 %s97_s11, 4  ;;  %24 = vst [vmem:[#allocation5] sm:$0xf] %v23_v0  ;;  %s31_s12 = int_to_ptr.vmem [resolvable:$true] %s30_s12 }
   0x7   :  { %35 = dma.vmem_to_hbm [thread:$0]  %s31_s12, 64, %s33_s15, [#allocation4]  }
   0x8   :  { %94 = dma.done.wait [#allocation4], 64  }
   0x9   :  { %95 = vsyncadd [#allocation4], 4294967232 }
   0xa   :  { %40 = vsyncpa [#allocation3], 1 }
   0xb   :  { %41 = vsyncpa [#allocation4], 1 }

</bundles_post_ra>
